<compile_context>
chip_gen: v6e
topology: v6e:2x2x1
jax: 0.10.0
libtpu: 0.0.40
codegen_flags: <defaults>
</compile_context>

<pallas_src>
import functools

import jax
import jax.numpy as jnp
from jax.experimental import pallas as pl
from jax.experimental.pallas import tpu as pltpu


# encoder: 784 -> 128 -> 64 -> 12 -> 3   (ReLU between, none on last)
# decoder:   3 ->  12 -> 64 -> 128 -> 784 (ReLU between, Sigmoid on last)
ENC_DIMS = [28 * 28, 128, 64, 12, 3]
DEC_DIMS = [3, 12, 64, 128, 28 * 28]

LANE = 128


def _round_up(x, m):
    return ((x + m - 1) // m) * m


def _pad_dim(d):
    """Pad narrow feature dims up to a full 128-lane vreg; leave >=128 alone."""
    return d if d >= LANE else LANE


def _linear(h, w_ref, b_ref):
    # bf16 MXU matmul with f32 accumulation; f32 bias add.
    return jnp.dot(h.astype(jnp.bfloat16), w_ref[...],
                   preferred_element_type=jnp.float32) + b_ref[...]


def autoencoder_kernel(x_ref,
                       # encoder params (pre-transposed, zero-padded, bf16 W / f32 b)
                       ew0, eb0, ew1, eb1, ew2, eb2, ew3, eb3,
                       # decoder params
                       dw0, db0, dw1, db1, dw2, db2, dw3, db3,
                       # outputs
                       enc_ref, dec_ref):
    h = x_ref[...]                                  # (TB, 784) bf16

    # ----- encoder -----
    h = jnp.maximum(_linear(h, ew0, eb0), 0.0)
    h = jnp.maximum(_linear(h, ew1, eb1), 0.0)
    h = jnp.maximum(_linear(h, ew2, eb2), 0.0)
    encoded = _linear(h, ew3, eb3)                  # (TB, 128): lanes 0..2 real, rest 0
    enc_ref[...] = encoded.astype(enc_ref.dtype)

    # ----- decoder -----
    h = jnp.maximum(_linear(encoded, dw0, db0), 0.0)
    h = jnp.maximum(_linear(h, dw1, db1), 0.0)
    h = jnp.maximum(_linear(h, dw2, db2), 0.0)
    logits = _linear(h, dw3, db3)                   # (TB, 784)
    dec_ref[...] = jax.nn.sigmoid(logits).astype(dec_ref.dtype)


def _prepare_params(params):
    """Cast W to bf16, keep b in f32, zero-pad narrow dims up to 128 lanes."""
    out = []
    for w, b in params:
        di, do = w.shape
        pi, po = _pad_dim(di), _pad_dim(do)
        wp = jnp.zeros((pi, po), jnp.bfloat16).at[:di, :do].set(w.astype(jnp.bfloat16))
        bp = jnp.zeros((1, po), jnp.float32).at[:, :do].set(b.astype(jnp.float32))
        out.append((wp, bp))
    return out


@functools.partial(jax.jit, static_argnames=("block_b",))
def autoencoder_forward(x, enc_params, dec_params, block_b=512):
    """x: (B, 784) f32. enc_params/dec_params: list of (W_(in,out), b_(1,out)) f32."""
    batch, d_in = x.shape
    assert d_in == ENC_DIMS[0]

    # Batch tile: multiple of 8 sublanes, capped at block_b, batch padded to a
    # whole number of tiles (last-tile correctness for B not divisible by TB).
    tb = min(block_b, _round_up(max(batch, 8), 8))
    b_pad = _round_up(batch, tb)

    x_p = x.astype(jnp.bfloat16)
    if b_pad != batch:
        x_p = jnp.pad(x_p, ((0, b_pad - batch), (0, 0)))

    flat_params = []
    for (w, b) in _prepare_params(enc_params) + _prepare_params(dec_params):
        flat_params.extend([w, b])

    grid = (b_pad // tb,)

    def _const_spec(a):
        # Full-shape block, same block index every grid step -> DMA'd once,
        # stays VMEM-resident across the whole batch loop.
        return pl.BlockSpec(a.shape, lambda i: (0, 0))

    in_specs = [pl.BlockSpec((tb, d_in), lambda i: (i, 0))]
    in_specs += [_const_spec(a) for a in flat_params]

    out_specs = (
        pl.BlockSpec((tb, LANE), lambda i: (i, 0)),     # lane-dense encoded slab
        pl.BlockSpec((tb, d_in), lambda i: (i, 0)),     # decoded
    )
    out_shape = (
        jax.ShapeDtypeStruct((b_pad, LANE), jnp.float32),
        jax.ShapeDtypeStruct((b_pad, d_in), jnp.float32),
    )

    # Advisory cost estimate (padded layer sizes = actual MXU work).
    layer_flops = 2 * (d_in * LANE + 6 * LANE * LANE + LANE * d_in)
    param_bytes = sum(int(a.size) * a.dtype.itemsize for a in flat_params)
    cost = pl.CostEstimate(
        flops=b_pad * layer_flops,
        transcendentals=b_pad * d_in,                   # sigmoid
        bytes_accessed=b_pad * d_in * 2                  # x read (bf16)
        + b_pad * d_in * 4                               # decoded write (f32)
        + b_pad * LANE * 4                               # encoded write (f32)
        + param_bytes,
    )

    encoded_pad, decoded_pad = pl.pallas_call(
        autoencoder_kernel,
        grid=grid,
        in_specs=in_specs,
        out_specs=out_specs,
        out_shape=out_shape,
        compiler_params=pltpu.CompilerParams(
            dimension_semantics=("parallel",)),          # v7x: shard batch over 2 TCs
        cost_estimate=cost,
    )(x_p, *flat_params)

    # Slice back to the logical (un-padded) outputs.
    return encoded_pad[:batch, :ENC_DIMS[-1]], decoded_pad[:batch, :d_in]


def init_params(key):
    """Deterministic init matching PyTorch Linear shapes (weights pre-transposed)."""
    def make_layers(dims, key):
        params = []
        for i in range(len(dims) - 1):
            key, kw, kb = jax.random.split(key, 3)
            fan_in, fan_out = dims[i], dims[i + 1]
            bound = 1.0 / jnp.sqrt(fan_in)
            # stored as (in, out) == W.T of torch's (out, in)
            w = jax.random.uniform(kw, (fan_in, fan_out), jnp.float32, -bound, bound)
            b = jax.random.uniform(kb, (1, fan_out), jnp.float32, -bound, bound)
            params.append((w, b))
        return params, key

    enc_params, key = make_layers(ENC_DIMS, key)
    dec_params, key = make_layers(DEC_DIMS, key)
    return enc_params, dec_params


def reference_forward(x, enc_params, dec_params):
    """Pure-JAX reference using the same bf16-weights / f32-accumulation math."""
    def lin(h, w, b):
        return jnp.dot(h.astype(jnp.bfloat16), w.astype(jnp.bfloat16),
                       preferred_element_type=jnp.float32) + b

    h = x
    for i, (w, b) in enumerate(enc_params):
        h = lin(h, w, b)
        if i < len(enc_params) - 1:
            h = jnp.maximum(h, 0.0)
    encoded = h
    h = encoded
    for i, (w, b) in enumerate(dec_params):
        h = lin(h, w, b)
        if i < len(dec_params) - 1:
            h = jnp.maximum(h, 0.0)
    decoded = jax.nn.sigmoid(h)
    return encoded, decoded


if __name__ == "__main__":
    key = jax.random.PRNGKey(0)
    key, kx = jax.random.split(key)

    batch = 2
    x = jax.random.uniform(kx, (batch, 28 * 28), jnp.float32)   # flattened MNIST-like input

    enc_params, dec_params = init_params(key)

    encoded, decoded = autoencoder_forward(x, enc_params, dec_params)
    jax.block_until_ready((encoded, decoded))

    # sanity check against pure-JAX reference (same bf16/f32 mixed precision)
    ref_enc, ref_dec = reference_forward(x, enc_params, dec_params)
    assert encoded.shape == (batch, 3) and decoded.shape == (batch, 28 * 28)
    assert jnp.allclose(encoded, ref_enc, atol=5e-3, rtol=5e-3)
    assert jnp.allclose(decoded, ref_dec, atol=5e-3, rtol=5e-3)

    print("KERNEL_OK")
</pallas_src>

<mosaic_0001>
module attributes {stable_mosaic.version = 11 : i64} {
  func.func @autoencoder_kernel(%arg0: i32, %arg1: memref<8x784xbf16, #tpu.memory_space<vmem>>, %arg2: memref<784x128xbf16, #tpu.memory_space<vmem>>, %arg3: memref<1x128xf32, #tpu.memory_space<vmem>>, %arg4: memref<128x128xbf16, #tpu.memory_space<vmem>>, %arg5: memref<1x128xf32, #tpu.memory_space<vmem>>, %arg6: memref<128x128xbf16, #tpu.memory_space<vmem>>, %arg7: memref<1x128xf32, #tpu.memory_space<vmem>>, %arg8: memref<128x128xbf16, #tpu.memory_space<vmem>>, %arg9: memref<1x128xf32, #tpu.memory_space<vmem>>, %arg10: memref<128x128xbf16, #tpu.memory_space<vmem>>, %arg11: memref<1x128xf32, #tpu.memory_space<vmem>>, %arg12: memref<128x128xbf16, #tpu.memory_space<vmem>>, %arg13: memref<1x128xf32, #tpu.memory_space<vmem>>, %arg14: memref<128x128xbf16, #tpu.memory_space<vmem>>, %arg15: memref<1x128xf32, #tpu.memory_space<vmem>>, %arg16: memref<128x784xbf16, #tpu.memory_space<vmem>>, %arg17: memref<1x784xf32, #tpu.memory_space<vmem>>, %arg18: memref<8x128xf32, #tpu.memory_space<vmem>>, %arg19: memref<8x784xf32, #tpu.memory_space<vmem>>) attributes {dimension_semantics = [#tpu.dimension_semantics<parallel>], iteration_bounds = array<i64: 1>, scalar_prefetch = 0 : i64, scratch_operands = 0 : i64, tpu.core_type = #tpu.core_type<tc>, window_params = [{transform_indices = @transform_0, window_bounds = array<i64: 8, 784>}, {pipeline_mode = #tpu.pipeline_mode<synchronous>, transform_indices = @transform_1, window_bounds = array<i64: 784, 128>}, {pipeline_mode = #tpu.pipeline_mode<synchronous>, transform_indices = @transform_2, window_bounds = array<i64: 1, 128>}, {pipeline_mode = #tpu.pipeline_mode<synchronous>, transform_indices = @transform_3, window_bounds = array<i64: 128, 128>}, {pipeline_mode = #tpu.pipeline_mode<synchronous>, transform_indices = @transform_4, window_bounds = array<i64: 1, 128>}, {pipeline_mode = #tpu.pipeline_mode<synchronous>, transform_indices = @transform_5, window_bounds = array<i64: 128, 128>}, {pipeline_mode = #tpu.pipeline_mode<synchronous>, transform_indices = @transform_6, window_bounds = array<i64: 1, 128>}, {pipeline_mode = #tpu.pipeline_mode<synchronous>, transform_indices = @transform_7, window_bounds = array<i64: 128, 128>}, {pipeline_mode = #tpu.pipeline_mode<synchronous>, transform_indices = @transform_8, window_bounds = array<i64: 1, 128>}, {pipeline_mode = #tpu.pipeline_mode<synchronous>, transform_indices = @transform_9, window_bounds = array<i64: 128, 128>}, {pipeline_mode = #tpu.pipeline_mode<synchronous>, transform_indices = @transform_10, window_bounds = array<i64: 1, 128>}, {pipeline_mode = #tpu.pipeline_mode<synchronous>, transform_indices = @transform_11, window_bounds = array<i64: 128, 128>}, {pipeline_mode = #tpu.pipeline_mode<synchronous>, transform_indices = @transform_12, window_bounds = array<i64: 1, 128>}, {pipeline_mode = #tpu.pipeline_mode<synchronous>, transform_indices = @transform_13, window_bounds = array<i64: 128, 128>}, {pipeline_mode = #tpu.pipeline_mode<synchronous>, transform_indices = @transform_14, window_bounds = array<i64: 1, 128>}, {pipeline_mode = #tpu.pipeline_mode<synchronous>, transform_indices = @transform_15, window_bounds = array<i64: 128, 784>}, {pipeline_mode = #tpu.pipeline_mode<synchronous>, transform_indices = @transform_16, window_bounds = array<i64: 1, 784>}, {transform_indices = @transform_17, window_bounds = array<i64: 8, 128>}, {transform_indices = @transform_18, window_bounds = array<i64: 8, 784>}]} {
    %c0 = arith.constant 0 : index
    %c0_0 = arith.constant 0 : index
    %0 = vector.load %arg1[%c0, %c0_0] : memref<8x784xbf16, #tpu.memory_space<vmem>>, vector<8x784xbf16>
    %c0_1 = arith.constant 0 : index
    %c0_2 = arith.constant 0 : index
    %1 = vector.load %arg2[%c0_1, %c0_2] : memref<784x128xbf16, #tpu.memory_space<vmem>>, vector<784x128xbf16>
    %cst = arith.constant dense<0.000000e+00> : vector<8x128xf32>
    %2 = tpu.matmul %0, %1, %cst {dimension_numbers = #tpu.dot_dimension_numbers<[1], [0], [0], [1], [0, 0, 1, 1], [], []>} : vector<8x784xbf16>, vector<784x128xbf16>, vector<8x128xf32> -> vector<8x128xf32>
    %c0_3 = arith.constant 0 : index
    %c0_4 = arith.constant 0 : index
    %3 = vector.load %arg3[%c0_3, %c0_4] : memref<1x128xf32, #tpu.memory_space<vmem>>, vector<1x128xf32>
    %4 = vector.broadcast %3 : vector<1x128xf32> to vector<8x128xf32>
    %5 = arith.addf %2, %4 : vector<8x128xf32>
    %cst_5 = arith.constant 0.000000e+00 : f32
    %6 = vector.broadcast %cst_5 : f32 to vector<8x128xf32>
    %7 = arith.maximumf %5, %6 : vector<8x128xf32>
    %8 = arith.truncf %7 : vector<8x128xf32> to vector<8x128xbf16>
    %c0_6 = arith.constant 0 : index
    %c0_7 = arith.constant 0 : index
    %9 = vector.load %arg4[%c0_6, %c0_7] : memref<128x128xbf16, #tpu.memory_space<vmem>>, vector<128x128xbf16>
    %cst_8 = arith.constant dense<0.000000e+00> : vector<8x128xf32>
    %10 = tpu.matmul %8, %9, %cst_8 {dimension_numbers = #tpu.dot_dimension_numbers<[1], [0], [0], [1], [0, 0, 1, 1], [], []>} : vector<8x128xbf16>, vector<128x128xbf16>, vector<8x128xf32> -> vector<8x128xf32>
    %c0_9 = arith.constant 0 : index
    %c0_10 = arith.constant 0 : index
    %11 = vector.load %arg5[%c0_9, %c0_10] : memref<1x128xf32, #tpu.memory_space<vmem>>, vector<1x128xf32>
    %12 = vector.broadcast %11 : vector<1x128xf32> to vector<8x128xf32>
    %13 = arith.addf %10, %12 : vector<8x128xf32>
    %cst_11 = arith.constant 0.000000e+00 : f32
    %14 = vector.broadcast %cst_11 : f32 to vector<8x128xf32>
    %15 = arith.maximumf %13, %14 : vector<8x128xf32>
    %16 = arith.truncf %15 : vector<8x128xf32> to vector<8x128xbf16>
    %c0_12 = arith.constant 0 : index
    %c0_13 = arith.constant 0 : index
    %17 = vector.load %arg6[%c0_12, %c0_13] : memref<128x128xbf16, #tpu.memory_space<vmem>>, vector<128x128xbf16>
    %cst_14 = arith.constant dense<0.000000e+00> : vector<8x128xf32>
    %18 = tpu.matmul %16, %17, %cst_14 {dimension_numbers = #tpu.dot_dimension_numbers<[1], [0], [0], [1], [0, 0, 1, 1], [], []>} : vector<8x128xbf16>, vector<128x128xbf16>, vector<8x128xf32> -> vector<8x128xf32>
    %c0_15 = arith.constant 0 : index
    %c0_16 = arith.constant 0 : index
    %19 = vector.load %arg7[%c0_15, %c0_16] : memref<1x128xf32, #tpu.memory_space<vmem>>, vector<1x128xf32>
    %20 = vector.broadcast %19 : vector<1x128xf32> to vector<8x128xf32>
    %21 = arith.addf %18, %20 : vector<8x128xf32>
    %cst_17 = arith.constant 0.000000e+00 : f32
    %22 = vector.broadcast %cst_17 : f32 to vector<8x128xf32>
    %23 = arith.maximumf %21, %22 : vector<8x128xf32>
    %24 = arith.truncf %23 : vector<8x128xf32> to vector<8x128xbf16>
    %c0_18 = arith.constant 0 : index
    %c0_19 = arith.constant 0 : index
    %25 = vector.load %arg8[%c0_18, %c0_19] : memref<128x128xbf16, #tpu.memory_space<vmem>>, vector<128x128xbf16>
    %cst_20 = arith.constant dense<0.000000e+00> : vector<8x128xf32>
    %26 = tpu.matmul %24, %25, %cst_20 {dimension_numbers = #tpu.dot_dimension_numbers<[1], [0], [0], [1], [0, 0, 1, 1], [], []>} : vector<8x128xbf16>, vector<128x128xbf16>, vector<8x128xf32> -> vector<8x128xf32>
    %c0_21 = arith.constant 0 : index
    %c0_22 = arith.constant 0 : index
    %27 = vector.load %arg9[%c0_21, %c0_22] : memref<1x128xf32, #tpu.memory_space<vmem>>, vector<1x128xf32>
    %28 = vector.broadcast %27 : vector<1x128xf32> to vector<8x128xf32>
    %29 = arith.addf %26, %28 : vector<8x128xf32>
    %c0_23 = arith.constant 0 : index
    %c0_24 = arith.constant 0 : index
    %30 = vector.load %arg18[%c0_23, %c0_24] : memref<8x128xf32, #tpu.memory_space<vmem>>, vector<8x128xf32>
    tpu.vector_store %arg18[%c0_23, %c0_24], %29 {strides = array<i32>} : memref<8x128xf32, #tpu.memory_space<vmem>>, vector<8x128xf32>,
    %31 = arith.truncf %29 : vector<8x128xf32> to vector<8x128xbf16>
    %c0_25 = arith.constant 0 : index
    %c0_26 = arith.constant 0 : index
    %32 = vector.load %arg10[%c0_25, %c0_26] : memref<128x128xbf16, #tpu.memory_space<vmem>>, vector<128x128xbf16>
    %cst_27 = arith.constant dense<0.000000e+00> : vector<8x128xf32>
    %33 = tpu.matmul %31, %32, %cst_27 {dimension_numbers = #tpu.dot_dimension_numbers<[1], [0], [0], [1], [0, 0, 1, 1], [], []>} : vector<8x128xbf16>, vector<128x128xbf16>, vector<8x128xf32> -> vector<8x128xf32>
    %c0_28 = arith.constant 0 : index
    %c0_29 = arith.constant 0 : index
    %34 = vector.load %arg11[%c0_28, %c0_29] : memref<1x128xf32, #tpu.memory_space<vmem>>, vector<1x128xf32>
    %35 = vector.broadcast %34 : vector<1x128xf32> to vector<8x128xf32>
    %36 = arith.addf %33, %35 : vector<8x128xf32>
    %cst_30 = arith.constant 0.000000e+00 : f32
    %37 = vector.broadcast %cst_30 : f32 to vector<8x128xf32>
    %38 = arith.maximumf %36, %37 : vector<8x128xf32>
    %39 = arith.truncf %38 : vector<8x128xf32> to vector<8x128xbf16>
    %c0_31 = arith.constant 0 : index
    %c0_32 = arith.constant 0 : index
    %40 = vector.load %arg12[%c0_31, %c0_32] : memref<128x128xbf16, #tpu.memory_space<vmem>>, vector<128x128xbf16>
    %cst_33 = arith.constant dense<0.000000e+00> : vector<8x128xf32>
    %41 = tpu.matmul %39, %40, %cst_33 {dimension_numbers = #tpu.dot_dimension_numbers<[1], [0], [0], [1], [0, 0, 1, 1], [], []>} : vector<8x128xbf16>, vector<128x128xbf16>, vector<8x128xf32> -> vector<8x128xf32>
    %c0_34 = arith.constant 0 : index
    %c0_35 = arith.constant 0 : index
    %42 = vector.load %arg13[%c0_34, %c0_35] : memref<1x128xf32, #tpu.memory_space<vmem>>, vector<1x128xf32>
    %43 = vector.broadcast %42 : vector<1x128xf32> to vector<8x128xf32>
    %44 = arith.addf %41, %43 : vector<8x128xf32>
    %cst_36 = arith.constant 0.000000e+00 : f32
    %45 = vector.broadcast %cst_36 : f32 to vector<8x128xf32>
    %46 = arith.maximumf %44, %45 : vector<8x128xf32>
    %47 = arith.truncf %46 : vector<8x128xf32> to vector<8x128xbf16>
    %c0_37 = arith.constant 0 : index
    %c0_38 = arith.constant 0 : index
    %48 = vector.load %arg14[%c0_37, %c0_38] : memref<128x128xbf16, #tpu.memory_space<vmem>>, vector<128x128xbf16>
    %cst_39 = arith.constant dense<0.000000e+00> : vector<8x128xf32>
    %49 = tpu.matmul %47, %48, %cst_39 {dimension_numbers = #tpu.dot_dimension_numbers<[1], [0], [0], [1], [0, 0, 1, 1], [], []>} : vector<8x128xbf16>, vector<128x128xbf16>, vector<8x128xf32> -> vector<8x128xf32>
    %c0_40 = arith.constant 0 : index
    %c0_41 = arith.constant 0 : index
    %50 = vector.load %arg15[%c0_40, %c0_41] : memref<1x128xf32, #tpu.memory_space<vmem>>, vector<1x128xf32>
    %51 = vector.broadcast %50 : vector<1x128xf32> to vector<8x128xf32>
    %52 = arith.addf %49, %51 : vector<8x128xf32>
    %cst_42 = arith.constant 0.000000e+00 : f32
    %53 = vector.broadcast %cst_42 : f32 to vector<8x128xf32>
    %54 = arith.maximumf %52, %53 : vector<8x128xf32>
    %55 = arith.truncf %54 : vector<8x128xf32> to vector<8x128xbf16>
    %c0_43 = arith.constant 0 : index
    %c0_44 = arith.constant 0 : index
    %56 = vector.load %arg16[%c0_43, %c0_44] : memref<128x784xbf16, #tpu.memory_space<vmem>>, vector<128x784xbf16>
    %cst_45 = arith.constant dense<0.000000e+00> : vector<8x784xf32>
    %57 = tpu.matmul %55, %56, %cst_45 {dimension_numbers = #tpu.dot_dimension_numbers<[1], [0], [0], [1], [0, 0, 1, 1], [], []>} : vector<8x128xbf16>, vector<128x784xbf16>, vector<8x784xf32> -> vector<8x784xf32>
    %c0_46 = arith.constant 0 : index
    %c0_47 = arith.constant 0 : index
    %58 = vector.load %arg17[%c0_46, %c0_47] : memref<1x784xf32, #tpu.memory_space<vmem>>, vector<1x784xf32>
    %59 = vector.broadcast %58 : vector<1x784xf32> to vector<8x784xf32>
    %60 = arith.addf %57, %59 : vector<8x784xf32>
    %61 = arith.negf %60 : vector<8x784xf32>
    %62 = math.exp %61 : vector<8x784xf32>
    %cst_48 = arith.constant 1.000000e+00 : f32
    %63 = vector.broadcast %cst_48 : f32 to vector<8x784xf32>
    %64 = arith.addf %63, %62 : vector<8x784xf32>
    %65 = arith.divf %63, %64 : vector<8x784xf32>
    %c0_49 = arith.constant 0 : index
    %c0_50 = arith.constant 0 : index
    %66 = vector.load %arg19[%c0_49, %c0_50] : memref<8x784xf32, #tpu.memory_space<vmem>>, vector<8x784xf32>
    tpu.vector_store %arg19[%c0_49, %c0_50], %65 {strides = array<i32>} : memref<8x784xf32, #tpu.memory_space<vmem>>, vector<8x784xf32>,
    return
  }
  func.func @transform_0(%arg0: i32) -> (i32, i32) {
    %c0_i32 = arith.constant 0 : i32
    %c0_i32_0 = arith.constant 0 : i32
    return %arg0, %c0_i32 : i32, i32
  }
  func.func @transform_1(%arg0: i32) -> (i32, i32) {
    %c0_i32 = arith.constant 0 : i32
    %c0_i32_0 = arith.constant 0 : i32
    %c0_i32_1 = arith.constant 0 : i32
    return %c0_i32, %c0_i32_0 : i32, i32
  }
  func.func @transform_2(%arg0: i32) -> (i32, i32) {
    %c0_i32 = arith.constant 0 : i32
    %c0_i32_0 = arith.constant 0 : i32
    %c0_i32_1 = arith.constant 0 : i32
    return %c0_i32, %c0_i32_0 : i32, i32
  }
  func.func @transform_3(%arg0: i32) -> (i32, i32) {
    %c0_i32 = arith.constant 0 : i32
    %c0_i32_0 = arith.constant 0 : i32
    %c0_i32_1 = arith.constant 0 : i32
    return %c0_i32, %c0_i32_0 : i32, i32
  }
  func.func @transform_4(%arg0: i32) -> (i32, i32) {
    %c0_i32 = arith.constant 0 : i32
    %c0_i32_0 = arith.constant 0 : i32
    %c0_i32_1 = arith.constant 0 : i32
    return %c0_i32, %c0_i32_0 : i32, i32
  }
  func.func @transform_5(%arg0: i32) -> (i32, i32) {
    %c0_i32 = arith.constant 0 : i32
    %c0_i32_0 = arith.constant 0 : i32
    %c0_i32_1 = arith.constant 0 : i32
    return %c0_i32, %c0_i32_0 : i32, i32
  }
  func.func @transform_6(%arg0: i32) -> (i32, i32) {
    %c0_i32 = arith.constant 0 : i32
    %c0_i32_0 = arith.constant 0 : i32
    %c0_i32_1 = arith.constant 0 : i32
    return %c0_i32, %c0_i32_0 : i32, i32
  }
  func.func @transform_7(%arg0: i32) -> (i32, i32) {
    %c0_i32 = arith.constant 0 : i32
    %c0_i32_0 = arith.constant 0 : i32
    %c0_i32_1 = arith.constant 0 : i32
    return %c0_i32, %c0_i32_0 : i32, i32
  }
  func.func @transform_8(%arg0: i32) -> (i32, i32) {
    %c0_i32 = arith.constant 0 : i32
    %c0_i32_0 = arith.constant 0 : i32
    %c0_i32_1 = arith.constant 0 : i32
    return %c0_i32, %c0_i32_0 : i32, i32
  }
  func.func @transform_9(%arg0: i32) -> (i32, i32) {
    %c0_i32 = arith.constant 0 : i32
    %c0_i32_0 = arith.constant 0 : i32
    %c0_i32_1 = arith.constant 0 : i32
    return %c0_i32, %c0_i32_0 : i32, i32
  }
  func.func @transform_10(%arg0: i32) -> (i32, i32) {
    %c0_i32 = arith.constant 0 : i32
    %c0_i32_0 = arith.constant 0 : i32
    %c0_i32_1 = arith.constant 0 : i32
    return %c0_i32, %c0_i32_0 : i32, i32
  }
  func.func @transform_11(%arg0: i32) -> (i32, i32) {
    %c0_i32 = arith.constant 0 : i32
    %c0_i32_0 = arith.constant 0 : i32
    %c0_i32_1 = arith.constant 0 : i32
    return %c0_i32, %c0_i32_0 : i32, i32
  }
  func.func @transform_12(%arg0: i32) -> (i32, i32) {
    %c0_i32 = arith.constant 0 : i32
    %c0_i32_0 = arith.constant 0 : i32
    %c0_i32_1 = arith.constant 0 : i32
    return %c0_i32, %c0_i32_0 : i32, i32
  }
  func.func @transform_13(%arg0: i32) -> (i32, i32) {
    %c0_i32 = arith.constant 0 : i32
    %c0_i32_0 = arith.constant 0 : i32
    %c0_i32_1 = arith.constant 0 : i32
    return %c0_i32, %c0_i32_0 : i32, i32
  }
  func.func @transform_14(%arg0: i32) -> (i32, i32) {
    %c0_i32 = arith.constant 0 : i32
    %c0_i32_0 = arith.constant 0 : i32
    %c0_i32_1 = arith.constant 0 : i32
    return %c0_i32, %c0_i32_0 : i32, i32
  }
  func.func @transform_15(%arg0: i32) -> (i32, i32) {
    %c0_i32 = arith.constant 0 : i32
    %c0_i32_0 = arith.constant 0 : i32
    %c0_i32_1 = arith.constant 0 : i32
    return %c0_i32, %c0_i32_0 : i32, i32
  }
  func.func @transform_16(%arg0: i32) -> (i32, i32) {
    %c0_i32 = arith.constant 0 : i32
    %c0_i32_0 = arith.constant 0 : i32
    %c0_i32_1 = arith.constant 0 : i32
    return %c0_i32, %c0_i32_0 : i32, i32
  }
  func.func @transform_17(%arg0: i32) -> (i32, i32) {
    %c0_i32 = arith.constant 0 : i32
    %c0_i32_0 = arith.constant 0 : i32
    return %arg0, %c0_i32 : i32, i32
  }
  func.func @transform_18(%arg0: i32) -> (i32, i32) {
    %c0_i32 = arith.constant 0 : i32
    %c0_i32_0 = arith.constant 0 : i32
    return %arg0, %c0_i32 : i32, i32
  }
}

</mosaic_0001>

<bundles_post_ra>
// kernel: autoencoder_forward.1
= control target key start
LH: loop header
LB: loop body
LE: loop exit
PB: predicated region body
PF: predicated region fallthrough
CT: control target
= control target key end

     0   :  { %v2606_v41 = vmov 0.0   ;;  %vm2607_vm0 = vmmov 0   ;;  %vm486_vm1 = vcmask 130048   ;;  %s3298_s1 = inlined_call_operand.vmem [shape: bf16[784,128], index: 1, kind: input, shape index: {}]   ;;  %s3299_s0 = inlined_call_operand.vmem [shape: bf16[8,784], index: 0, kind: input, shape index: {}]   ;;  %s3300_s3 = inlined_call_operand.vmem [shape: bf16[128,128], index: 3, kind: input, shape index: {}]   ;;  %s3301_s5 = inlined_call_operand.vmem [shape: bf16[128,128], index: 5, kind: input, shape index: {}]   ;;  %s3302_s2 = inlined_call_operand.vmem [shape: f32[1,128], index: 2, kind: input, shape index: {}]   ;;  %s3303_s7 = inlined_call_operand.vmem [shape: bf16[128,128], index: 7, kind: input, shape index: {}]   ;;  %s3304_s4 = inlined_call_operand.vmem [shape: f32[1,128], index: 4, kind: input, shape index: {}]   ;;  %s3305_s9 = inlined_call_operand.vmem [shape: bf16[128,128], index: 9, kind: input, shape index: {}]   ;;  %s3306_s6 = inlined_call_operand.vmem [shape: f32[1,128], index: 6, kind: input, shape index: {}]   ;;  %s3307_s11 = inlined_call_operand.vmem [shape: bf16[128,128], index: 11, kind: input, shape index: {}]   ;;  %s3308_s8 = inlined_call_operand.vmem [shape: f32[1,128], index: 8, kind: input, shape index: {}]   ;;  %s3309_s17 = inlined_call_operand.vmem [shape: f32[8,128], index: 17, kind: output, shape index: {0}]   ;;  %s3310_s13 = inlined_call_operand.vmem [shape: bf16[128,128], index: 13, kind: input, shape index: {}]   ;;  %s3311_s10 = inlined_call_operand.vmem [shape: f32[1,128], index: 10, kind: input, shape index: {}]   ;;  %s3312_s15 = inlined_call_operand.vmem [shape: bf16[128,784], index: 15, kind: input, shape index: {}]   ;;  %s3313_s12 = inlined_call_operand.vmem [shape: f32[1,128], index: 12, kind: input, shape index: {}]   ;;  %s3314_s14 = inlined_call_operand.vmem [shape: f32[1,128], index: 14, kind: input, shape index: {}]   ;;  %s3315_s16 = inlined_call_operand.vmem [shape: f32[1,784], index: 16, kind: input, shape index: {}]   ;;  %s3316_s18 = inlined_call_operand.vmem [shape: f32[8,784], index: 18, kind: output, shape index: {1}]  }
   0x1   :  { %3320 = sst [smem:[#allocation2_spill]] %s3298_s1 }
   0x2   :  { %3321 = sst [smem:[#allocation3_spill]] %s3299_s0 }
   0x3   :  { %3322 = sst [smem:[#allocation4_spill]] %s3300_s3 }
   0x4   :  { %s3323_s29 = sld [smem:[#allocation2_spill]] }
   0x5   :  { %s3324_s22 = sld [smem:[#allocation3_spill]] }
   0x6   :  { %s3325_s26 = sld [smem:[#allocation4_spill]] }
   0xa   :  { %v2394_v0 = vld [vmem:[%s3323_s29 + $0x78] sm:$0xff]   ;;  %v2398_v4 = vld [vmem:[%s3323_s29 + $0x70] sm:$0xff]   ;;  %v2402_v8 = vld [vmem:[%s3323_s29 + $0x68] sm:$0xff]  }
   0xb   :  { %v2395_v1 = vld [vmem:[%s3323_s29 + $0x38] sm:$0xff]   ;;  %2114 = vmatprep.subr.bf16.mxu0 %v2394_v0  ;;  %v2399_v5 = vld [vmem:[%s3323_s29 + $0x30] sm:$0xff]   ;;  %v2403_v9 = vld [vmem:[%s3323_s29 + $0x28] sm:$0xff]  }
   0xc   :  { %v2396_v2 = vld [vmem:[%s3323_s29 + $0xf8] sm:$0xff]   ;;  %2115 = vmatpush3.bf16.msra.mxu0 %v2395_v1  ;;  %v2400_v6 = vld [vmem:[%s3323_s29 + $0xf0] sm:$0xff]   ;;  %v2404_v10 = vld [vmem:[%s3323_s29 + $0xe8] sm:$0xff]  }
   0xd   :  { %v2397_v3 = vld [vmem:[%s3323_s29 + $0xb8] sm:$0xff]   ;;  %2136 = vmatprep.subr.bf16.mxu1 %v2396_v2  ;;  %2116 = vmatprep.subr.bf16.mxu0 %v2398_v4  ;;  %v2401_v7 = vld [vmem:[%s3323_s29 + $0xb0] sm:$0xff]   ;;  %v2405_v11 = vld [vmem:[%s3323_s29 + $0xa8] sm:$0xff]  }
   0xe   :  { %2137 = vmatpush3.bf16.msra.mxu1 %v2397_v3  ;;  %v2406_v12 = vld [vmem:[%s3323_s29 + $0x60] sm:$0xff]   ;;  %v2410_v16 = vld [vmem:[%s3323_s29 + $0x58] sm:$0xff]   ;;  %v2414_v20 = vld [vmem:[%s3323_s29 + $0x50] sm:$0xff]  }
   0xf   :  { %2138 = vmatprep.subr.bf16.mxu1 %v2400_v6  ;;  %v2407_v13 = vld [vmem:[%s3323_s29 + $0x20] sm:$0xff]   ;;  %v2411_v17 = vld [vmem:[%s3323_s29 + $0x18] sm:$0xff]   ;;  %v2415_v21 = vld [vmem:[%s3323_s29 + $0x10] sm:$0xff]  }
  0x10   :  { %2117 = vmatpush3.bf16.msra.mxu0 %v2399_v5  ;;  %v2408_v14 = vld [vmem:[%s3323_s29 + $0xe0] sm:$0xff]   ;;  %v2412_v18 = vld [vmem:[%s3323_s29 + $0xd8] sm:$0xff]   ;;  %v2416_v22 = vld [vmem:[%s3323_s29 + $0xd0] sm:$0xff]  }
  0x11   :  { %2118 = vmatprep.subr.bf16.mxu0 %v2402_v8  ;;  %v2409_v15 = vld [vmem:[%s3323_s29 + $0xa0] sm:$0xff]   ;;  %v2413_v19 = vld [vmem:[%s3323_s29 + $0x98] sm:$0xff]   ;;  %v2417_v23 = vld [vmem:[%s3323_s29 + $0x90] sm:$0xff]  }
  0x12   :  { %2139 = vmatpush3.bf16.msra.mxu1 %v2401_v7  ;;  %v2418_v24 = vld [vmem:[%s3323_s29 + $0x48] sm:$0xff]   ;;  %v2422_v28 = vld [vmem:[%s3323_s29 + $0x40] sm:$0xff]   ;;  %v2429_v35 = vld [vmem:[%s3323_s29 + $0x178] sm:$0xff]  }
  0x13   :  { %2140 = vmatprep.subr.bf16.mxu1 %v2404_v10  ;;  %v2419_v25 = vld [vmem:[%s3323_s29 + $0x8] sm:$0xff]   ;;  %v2423_v29 = vld [vmem:[%s3323_s29] sm:$0xff]   ;;  %v2432_v39 = vld [vmem:[%s3323_s29 + $0x138] sm:$0xff]  }
  0x14   :  { %2119 = vmatpush3.bf16.msra.mxu0 %v2403_v9  ;;  %v2420_v26 = vld [vmem:[%s3323_s29 + $0xc8] sm:$0xff]   ;;  %v2424_v30 = vld [vmem:[%s3323_s29 + $0xc0] sm:$0xff]   ;;  %v2433_v40 = vld [vmem:[%s3323_s29 + $0x170] sm:$0xff]  }
  0x15   :  { %2120 = vmatprep.subr.bf16.mxu0 %v2406_v12  ;;  %v2421_v27 = vld [vmem:[%s3323_s29 + $0x88] sm:$0xff]   ;;  %v59_v31 = vld [vmem:[%s3324_s22] sm:$0xff]  ;;  %v2434_v42 = vld [vmem:[%s3323_s29 + $0x130] sm:$0xff]  }
  0x16   :  { %2141 = vmatpush3.bf16.msra.mxu1 %v2405_v11  ;;  %v1940_v32 = vcombine.low %v59_v31, %v59_v31  ;;  %v1941_v33 = vcombine.high %v59_v31, %v59_v31  ;;  %v2428_v34 = vld [vmem:[%s3323_s29 + $0x80] sm:$0xff]   ;;  %v60_v36 = vld [vmem:[%s3324_s22 + $0x8] sm:$0xff]  ;;  %v2439_v47 = vld [vmem:[%s3323_s29 + $0x158] sm:$0xff]  }
  0x17   :  { %2142 = vmatprep.subr.bf16.mxu1 %v2408_v14  ;;  %v1942_v37 = vcombine.low %v60_v36, %v60_v36  ;;  %v1943_v38 = vcombine.high %v60_v36, %v60_v36  ;;  %v2435_v43 = vld [vmem:[%s3323_s29 + $0x168] sm:$0xff]   ;;  %v2437_v45 = vld [vmem:[%s3323_s29 + $0x160] sm:$0xff]   ;;  %v2440_v48 = vld [vmem:[%s3323_s29 + $0x118] sm:$0xff]  }
  0x18   :  { %2121 = vmatpush3.bf16.msra.mxu0 %v2407_v13  ;;  %522 = vmatprep.mubr.bf16.mxu0 %v1941_v33  ;;  %v2436_v44 = vld [vmem:[%s3323_s29 + $0x128] sm:$0xff]   ;;  %v2438_v46 = vld [vmem:[%s3323_s29 + $0x120] sm:$0xff]   ;;  %v2441_v49 = vld [vmem:[%s3323_s29 + $0x150] sm:$0xff]  }
  0x19   :  { %2122 = vmatprep.subr.bf16.mxu0 %v2410_v16  ;;  %562 = vmatprep.mubr.bf16.mxu1 %v1943_v38  ;;  %v2447_v50 = vld [vmem:[%s3323_s29 + $0x180] sm:$0xff]   ;;  %v61_v51 = vld [vmem:[%s3324_s22 + $0x10] sm:$0xff]  ;;  %v2427_v52 = vld [vmem:[%s3324_s22 + $0x18] ss:$0 sps:$4 sm:$0xff]  }
  0x1a   :  { %2143 = vmatpush3.bf16.msra.mxu1 %v2409_v15  ;;  %v1945_v53 = vcombine.high %v61_v51, %v61_v51  ;;  %v2442_v54 = vld [vmem:[%s3323_s29 + $0x110] sm:$0xff]   ;;  %v2443_v55 = vld [vmem:[%s3323_s29 + $0x148] sm:$0xff]   ;;  %v2445_v57 = vld [vmem:[%s3323_s29 + $0x140] sm:$0xff]   ;;  %v1944_v59 = vcombine.low %v61_v51, %v61_v51 }
  0x1b   :  { %2144 = vmatprep.subr.bf16.mxu1 %v2412_v18  ;;  %v2444_v56 = vld [vmem:[%s3323_s29 + $0x108] sm:$0xff]   ;;  %v2446_v58 = vld [vmem:[%s3323_s29 + $0x100] sm:$0xff]   ;;  %v2450_v60 = vld [vmem:[%s3325_s26 + $0x38] sm:$0xff]  }
  0x1c   :  { %2123 = vmatpush3.bf16.msra.mxu0 %v2411_v17  ;;  %v2451_v61 = vld [vmem:[%s3325_s26 + $0x30] sm:$0xff]   ;;  %v2452_v62 = vld [vmem:[%s3325_s26 + $0x28] sm:$0xff]   ;;  %v2453_v63 = vld [vmem:[%s3325_s26 + $0x20] sm:$0xff]  }
  0x1d   :  { %2124 = vmatprep.subr.bf16.mxu0 %v2414_v20  ;;  %v2454_v0 = vld [vmem:[%s3325_s26 + $0x18] sm:$0xff]   ;;  %v2455_v1 = vld [vmem:[%s3325_s26 + $0x10] sm:$0xff]   ;;  %v2456_v2 = vld [vmem:[%s3325_s26 + $0x8] sm:$0xff]  }
  0x1e   :  { %2145 = vmatpush3.bf16.msra.mxu1 %v2413_v19  ;;  %v2457_v3 = vld [vmem:[%s3325_s26] sm:$0xff]   ;;  %v2458_v4 = vld [vmem:[%s3301_s5 + $0x38] sm:$0xff]   ;;  %v2459_v5 = vld [vmem:[%s3301_s5 + $0x30] sm:$0xff]  }
  0x1f   :  { %2146 = vmatprep.subr.bf16.mxu1 %v2416_v22  ;;  %v2460_v6 = vld [vmem:[%s3301_s5 + $0x28] sm:$0xff]   ;;  %v2461_v7 = vld [vmem:[%s3301_s5 + $0x20] sm:$0xff]   ;;  %v2462_v8 = vld [vmem:[%s3301_s5 + $0x18] sm:$0xff]  }
  0x20   :  { %2125 = vmatpush3.bf16.msra.mxu0 %v2415_v21  ;;  %v2463_v9 = vld [vmem:[%s3301_s5 + $0x10] sm:$0xff]   ;;  %v2464_v36 = vld [vmem:[%s3301_s5 + $0x8] sm:$0xff]   ;;  %v2466_v38 = vld [vmem:[%s3303_s7 + $0x38] sm:$0xff]  }
  0x21   :  { %2126 = vmatprep.subr.bf16.mxu0 %v2418_v24 }
  0x22   :  { %2147 = vmatpush3.bf16.msra.mxu1 %v2417_v23  ;;  %v1939_v23 = vld [vmem:[%s3302_s2] ss:$0 sm:$0xff] }
  0x23   :  { %2148 = vmatprep.subr.bf16.mxu1 %v2420_v26 }
  0x24   :  { %2127 = vmatpush3.bf16.msra.mxu0 %v2419_v25 }
  0x25   :  { %2128 = vmatprep.subr.bf16.mxu0 %v2422_v28 }
  0x26   :  { %2149 = vmatpush3.bf16.msra.mxu1 %v2421_v27 }
  0x27   :  { %2150 = vmatprep.subr.bf16.mxu1 %v2424_v30 }
  0x28   :  { %2129 = vmatpush3.bf16.msra.mxu0 %v2423_v29 }
  0x29   :  { %2158 = vmatprep.subr.bf16.mxu0 %v2429_v35 }
  0x2a   :  { %2151 = vmatpush3.bf16.msra.mxu1 %v2428_v34 }
  0x2b   :  { %523 = vmatmul.mubr.bf16.vlgmr.msra.gmra.mxu0 %v1940_v32  ;;  %2245 = vmatprep.subr.bf16.mxu1 %v2606_v41 }
  0x2c   :  { %2159 = vmatpush3.bf16.msra.mxu0 %v2432_v39  ;;  %602 = vmatprep.mubr.bf16.mxu0 %v1945_v53  ;;  %v2467_v39 = vld [vmem:[%s3303_s7 + $0x30] sm:$0xff]   ;;  %v2472_v53 = vld [vmem:[%s3303_s7 + $0x8] sm:$0xff]  }
  0x2d   :  { %563 = vmatmul.mubr.bf16.vlgmr.msra.gmra.mxu1 %v1942_v37  ;;  %2160 = vmatprep.subr.bf16.mxu0 %v2433_v40  ;;  %v2465_v37 = vld [vmem:[%s3301_s5] sm:$0xff]   ;;  %v2468_v40 = vld [vmem:[%s3303_s7 + $0x28] sm:$0xff]  }
  0x2e   :  { %2247 = vmatprep.mubr.msk.bf16.mxu1 %vm2607_vm0, %v2606_v41  ;;  %2246 = vmatpush3.bf16.msra.mxu1 %v2447_v50 }
  0x2f   :  { %2251 = vmatprep.subr.bf16.mxu1 %v2606_v41 }
  0x30   :  { %2161 = vmatpush3.bf16.msra.mxu0 %v2434_v42  ;;  %v2469_v42 = vld [vmem:[%s3303_s7 + $0x20] sm:$0xff]  }
  0x31   :  { %2162 = vmatprep.subr.bf16.mxu0 %v2435_v43  ;;  %v2470_v43 = vld [vmem:[%s3303_s7 + $0x18] sm:$0xff]  }
  0x34   :  { %2163 = vmatpush3.bf16.msra.mxu0 %v2436_v44  ;;  %v2471_v44 = vld [vmem:[%s3303_s7 + $0x10] sm:$0xff]  }
  0x35   :  { %2164 = vmatprep.subr.bf16.mxu0 %v2437_v45  ;;  %2248 = vmatmul.mubr.msk.bf16.vlgmr.msra.gmra.mxu1 %vm486_vm1, %v2427_v52  ;;  %v1997_v45 = vld [vmem:[%s3304_s4] ss:$0 sm:$0xff] }
  0x36   :  { %2267 = vmatprep.mubr.msk.bf16.mxu1 %vm2607_vm0, %v2606_v41  ;;  %2252 = vmatpush3.bf16.msra.mxu1 %v2450_v60  ;;  %v2479_v60 = vld [vmem:[%s3305_s9 + $0x10] sm:$0xff]  }
  0x37   :  { %2253 = vmatprep.subr.bf16.mxu1 %v2606_v41 }
  0x38   :  { %2165 = vmatpush3.bf16.msra.mxu0 %v2438_v46 }
  0x39   :  { %2166 = vmatprep.subr.bf16.mxu0 %v2439_v47 }
  0x3a   :  { %2254 = vmatpush3.bf16.msra.mxu1 %v2451_v61  ;;  %v2480_v61 = vld [vmem:[%s3305_s9 + $0x8] sm:$0xff]  }
  0x3b   :  { %2255 = vmatprep.subr.bf16.mxu1 %v2606_v41 }
  0x3c   :  { %2167 = vmatpush3.bf16.msra.mxu0 %v2440_v48 }
  0x3d   :  { %2168 = vmatprep.subr.bf16.mxu0 %v2441_v49 }
  0x3e   :  { %2256 = vmatpush3.bf16.msra.mxu1 %v2452_v62  ;;  %v2006_v62 = vld [vmem:[%s3306_s6] ss:$0 sm:$0xff] }
  0x3f   :  { %2257 = vmatprep.subr.bf16.mxu1 %v2606_v41 }
  0x40   :  { %2169 = vmatpush3.bf16.msra.mxu0 %v2442_v54  ;;  %v2473_v54 = vld [vmem:[%s3303_s7] sm:$0xff]  }
  0x41   :  { %2170 = vmatprep.subr.bf16.mxu0 %v2443_v55  ;;  %v2474_v55 = vld [vmem:[%s3305_s9 + $0x38] sm:$0xff]  }
  0x42   :  { %2258 = vmatpush3.bf16.msra.mxu1 %v2453_v63 }
  0x43   :  { %2259 = vmatprep.subr.bf16.mxu1 %v2606_v41 }
  0x44   :  { %2171 = vmatpush3.bf16.msra.mxu0 %v2444_v56  ;;  %v2475_v56 = vld [vmem:[%s3305_s9 + $0x30] sm:$0xff]  }
  0x45   :  { %2172 = vmatprep.subr.bf16.mxu0 %v2445_v57  ;;  %v2476_v57 = vld [vmem:[%s3305_s9 + $0x28] sm:$0xff]  }
  0x46   :  { %2260 = vmatpush3.bf16.msra.mxu1 %v2454_v0 }
  0x47   :  { %2261 = vmatprep.subr.bf16.mxu1 %v2606_v41 }
  0x48   :  { %2173 = vmatpush3.bf16.msra.mxu0 %v2446_v58  ;;  %v2477_v58 = vld [vmem:[%s3305_s9 + $0x20] sm:$0xff]  }
  0x49   :  { %2271 = vmatprep.subr.bf16.mxu0 %v2606_v41 }
  0x4a   :  { %2262 = vmatpush3.bf16.msra.mxu1 %v2455_v1 }
  0x4b   :  { %603 = vmatmul.mubr.bf16.vlgmr.msra.gmra.mxu0 %v1944_v59  ;;  %2263 = vmatprep.subr.bf16.mxu1 %v2606_v41  ;;  %v2478_v59 = vld [vmem:[%s3305_s9 + $0x18] sm:$0xff]  }
  0x4c   :  { %2287 = vmatprep.mubr.msk.bf16.mxu0 %vm2607_vm0, %v2606_v41  ;;  %2272 = vmatpush3.bf16.msra.mxu0 %v2458_v4 }
  0x4d   :  { %2273 = vmatprep.subr.bf16.mxu0 %v2606_v41 }
  0x4e   :  { %2264 = vmatpush3.bf16.msra.mxu1 %v2456_v2 }
  0x4f   :  { %2265 = vmatprep.subr.bf16.mxu1 %v2606_v41 }
  0x50   :  { %2274 = vmatpush3.bf16.msra.mxu0 %v2459_v5 }
  0x51   :  { %2275 = vmatprep.subr.bf16.mxu0 %v2606_v41 }
  0x52   :  { %2266 = vmatpush3.bf16.msra.mxu1 %v2457_v3 }
  0x53   :  { %2291 = vmatprep.subr.bf16.mxu1 %v2606_v41 }
  0x54   :  { %2276 = vmatpush3.bf16.msra.mxu0 %v2460_v6  ;;  %v2481_v6 = vld [vmem:[%s3305_s9] sm:$0xff]  }
  0x55   :  { %2277 = vmatprep.subr.bf16.mxu0 %v2606_v41 }
  0x58   :  { %2278 = vmatpush3.bf16.msra.mxu0 %v2461_v7  ;;  %v2482_v7 = vld [vmem:[%s3307_s11 + $0x38] sm:$0xff]  }
  0x59   :  { %2279 = vmatprep.subr.bf16.mxu0 %v2606_v41 }
  0x5c   :  { %2280 = vmatpush3.bf16.msra.mxu0 %v2462_v8  ;;  %v2483_v8 = vld [vmem:[%s3307_s11 + $0x30] sm:$0xff]  }
  0x5d   :  { %2281 = vmatprep.subr.bf16.mxu0 %v2606_v41 }
  0x60   :  { %2282 = vmatpush3.bf16.msra.mxu0 %v2463_v9  ;;  %v2484_v9 = vld [vmem:[%s3307_s11 + $0x28] sm:$0xff]  }
  0x61   :  { %2283 = vmatprep.subr.bf16.mxu0 %v2606_v41 }
  0x64   :  { %2284 = vmatpush3.bf16.msra.mxu0 %v2464_v36  ;;  %v2496_v36 = vld [vmem:[%s3310_s13 + $0x8] sm:$0xff]  }
  0x65   :  { %2285 = vmatprep.subr.bf16.mxu0 %v2606_v41 }
  0x68   :  { %2286 = vmatpush3.bf16.msra.mxu0 %v2465_v37  ;;  %v2497_v37 = vld [vmem:[%s3310_s13] sm:$0xff]  }
  0x69   :  { %2311 = vmatprep.subr.bf16.mxu0 %v2606_v41 }
  0xeb   :  { %v2130_v10 = vpop.f32.mrf.mxu0 }
  0xed   :  { %v2131_v11 = vpop.f32.mrf.mxu0  ;;  %v2152_v12 = vpop.f32.mrf.mxu1 }
  0xee   :  { %v2132_v22 = vadd.f32 %v2131_v11, %v2130_v10  ;;  %v2485_v10 = vld [vmem:[%s3307_s11 + $0x20] sm:$0xff]   ;;  %v2486_v11 = vld [vmem:[%s3307_s11 + $0x18] sm:$0xff]  }
  0xef   :  { %v2133_v13 = vpop.f32.mrf.mxu0  ;;  %v2153_v14 = vpop.f32.mrf.mxu1 }
  0xf0   :  { %v525_v24 = vadd.f32 %v2132_v22, %v1939_v23  ;;  %v2154_v25 = vadd.f32 %v2153_v14, %v2152_v12  ;;  %v2487_v12 = vld [vmem:[%s3307_s11 + $0x10] sm:$0xff]   ;;  %v2015_v13 = vld [vmem:[%s3308_s8] ss:$0 sm:$0xff]  ;;  %v2490_v22 = vld [vmem:[%s3310_s13 + $0x38] sm:$0xff]  }
  0xf1   :  { %v2134_v15 = vpop.f32.mrf.mxu0  ;;  %v2155_v16 = vpop.f32.mrf.mxu1  ;;  %v2491_v23 = vld [vmem:[%s3310_s13 + $0x30] sm:$0xff]  }
  0xf2   :  { %v565_v28 = vadd.f32 %v2154_v25, %v525_v24  ;;  %v2492_v24 = vld [vmem:[%s3310_s13 + $0x28] sm:$0xff]   ;;  %v2493_v25 = vld [vmem:[%s3310_s13 + $0x20] sm:$0xff]  }
  0xf3   :  { %v2156_v17 = vpop.f32.mrf.mxu1 }
  0xf5   :  { %v644_v18 = vpop.f32.mrf.mxu1 }
  0xf7   :  { %v2249_v19 = vpop.f32.mrf.mxu1 }
  0xf9   :  { %v647_v20 = vpop.f32.mrf.mxu1 }
  0xfa   :  { %v2488_v20 = vld [vmem:[%s3307_s11 + $0x8] sm:$0xff]  }
  0xfb   :  { %v2250_v21 = vpop.f32.mrf.mxu1 }
  0xfc   :  { %v2489_v21 = vld [vmem:[%s3307_s11] sm:$0xff]  }
 0x10b   :  { %v2174_v26 = vpop.f32.mrf.mxu0 }
 0x10d   :  { %v2175_v27 = vpop.f32.mrf.mxu0 }
 0x10e   :  { %v2176_v29 = vadd.f32 %v2175_v27, %v2174_v26  ;;  %v2494_v26 = vld [vmem:[%s3310_s13 + $0x18] sm:$0xff]   ;;  %v2495_v27 = vld [vmem:[%s3310_s13 + $0x10] sm:$0xff]  }
 0x10f   :  { %v2177_v30 = vpop.f32.mrf.mxu0 }
 0x110   :  { %v605_v31 = vadd.f32 %v2176_v29, %v565_v28  ;;  %v2024_v28 = vld [vmem:[%s3311_s10] ss:$0 sm:$0xff] }
 0x111   :  { %v2178_v32 = vpop.f32.mrf.mxu0 }
 0x112   :  { %v645_v33 = vadd.f32 %v644_v18, %v605_v31 }
 0x114   :  { %v650_v34 = vmax.f32 %v645_v33, 0.0 }
 0x116   :  { %v651_v35 = vpack.c.bf16 %v650_v34, %v650_v34 }
 0x118   :  { %2268 = vmatmul.mubr.bf16.vlgmr.msra.gmra.mxu1 %v651_v35 }
 0x119   :  { %2307 = vmatprep.mubr.msk.bf16.mxu1 %vm2607_vm0, %v2606_v41  ;;  %2292 = vmatpush3.bf16.msra.mxu1 %v2466_v38  ;;  %v2498_v38 = vld [vmem:[%s3312_s15 + $0x188] ss:$28 sps:$4 sm:$0xff]  }
 0x11a   :  { %2293 = vmatprep.subr.bf16.mxu1 %v2606_v41 }
 0x11d   :  { %2294 = vmatpush3.bf16.msra.mxu1 %v2467_v39  ;;  %v2500_v39 = vld [vmem:[%s3312_s15 + $0x18c] ss:$28 sps:$4 sm:$0xff]  }
 0x11e   :  { %2295 = vmatprep.subr.bf16.mxu1 %v2606_v41 }
 0x121   :  { %2296 = vmatpush3.bf16.msra.mxu1 %v2468_v40  ;;  %v2503_v40 = vld [vmem:[%s3312_s15 + $0x194] ss:$28 sps:$4 sm:$0xff]  }
 0x122   :  { %2297 = vmatprep.subr.bf16.mxu1 %v2606_v41 }
 0x125   :  { %2298 = vmatpush3.bf16.msra.mxu1 %v2469_v42  ;;  %v2506_v42 = vld [vmem:[%s3312_s15 + $0x154] ss:$28 sps:$4 sm:$0xff]  }
 0x126   :  { %2299 = vmatprep.subr.bf16.mxu1 %v2606_v41 }
 0x129   :  { %2300 = vmatpush3.bf16.msra.mxu1 %v2470_v43  ;;  %v2504_v43 = vld [vmem:[%s3312_s15 + $0x150] ss:$28 sps:$4 sm:$0xff]  }
 0x12a   :  { %2301 = vmatprep.subr.bf16.mxu1 %v2606_v41 }
 0x12d   :  { %2302 = vmatpush3.bf16.msra.mxu1 %v2471_v44  ;;  %v2512_v44 = vld [vmem:[%s3312_s15 + $0x11c] ss:$28 sps:$4 sm:$0xff]  }
 0x12e   :  { %2303 = vmatprep.subr.bf16.mxu1 %v2606_v41 }
 0x131   :  { %2304 = vmatpush3.bf16.msra.mxu1 %v2472_v53  ;;  %v2534_v53 = vld [vmem:[%s3312_s15 + $0x38] ss:$28 sps:$4 sm:$0xff]  }
 0x132   :  { %2305 = vmatprep.subr.bf16.mxu1 %v2606_v41 }
 0x135   :  { %2306 = vmatpush3.bf16.msra.mxu1 %v2473_v54  ;;  %v2033_v54 = vld [vmem:[%s3313_s12] ss:$0 sm:$0xff] }
 0x136   :  { %2331 = vmatprep.subr.bf16.mxu1 %v2606_v41 }
 0x1d8   :  { %v757_v46 = vpop.f32.mrf.mxu1 }
 0x1d9   :  { %v758_v47 = vadd.f32 %v1997_v45, %v757_v46  ;;  %v2510_v45 = vld [vmem:[%s3312_s15 + $0x118] ss:$28 sps:$4 sm:$0xff]   ;;  %v2518_v46 = vld [vmem:[%s3312_s15 + $0xe4] ss:$28 sps:$4 sm:$0xff]  }
 0x1da   :  { %v2269_v48 = vpop.f32.mrf.mxu1 }
 0x1db   :  { %v763_v49 = vmax.f32 %v758_v47, 0.0  ;;  %v2516_v47 = vld [vmem:[%s3312_s15 + $0xe0] ss:$28 sps:$4 sm:$0xff]   ;;  %v2524_v48 = vld [vmem:[%s3312_s15 + $0xac] ss:$28 sps:$4 sm:$0xff]  }
 0x1dc   :  { %v760_v50 = vpop.f32.mrf.mxu1 }
 0x1dd   :  { %v764_v51 = vpack.c.bf16 %v763_v49, %v763_v49  ;;  %v2522_v49 = vld [vmem:[%s3312_s15 + $0xa8] ss:$28 sps:$4 sm:$0xff]   ;;  %v2530_v50 = vld [vmem:[%s3312_s15 + $0x74] ss:$28 sps:$4 sm:$0xff]  }
 0x1de   :  { %v2270_v52 = vpop.f32.mrf.mxu1 }
 0x1df   :  { %2288 = vmatmul.mubr.bf16.vlgmr.msra.gmra.mxu0 %v764_v51  ;;  %v2528_v51 = vld [vmem:[%s3312_s15 + $0x70] ss:$28 sps:$4 sm:$0xff]   ;;  %v2536_v52 = vld [vmem:[%s3312_s15 + $0x3c] ss:$28 sps:$4 sm:$0xff]  }
 0x1e0   :  { %2327 = vmatprep.mubr.msk.bf16.mxu0 %vm2607_vm0, %v2606_v41  ;;  %2312 = vmatpush3.bf16.msra.mxu0 %v2474_v55 }
 0x1e1   :  { %2313 = vmatprep.subr.bf16.mxu0 %v2606_v41 }
 0x1e4   :  { %2314 = vmatpush3.bf16.msra.mxu0 %v2475_v56 }
 0x1e5   :  { %2315 = vmatprep.subr.bf16.mxu0 %v2606_v41 }
 0x1e8   :  { %2316 = vmatpush3.bf16.msra.mxu0 %v2476_v57 }
 0x1e9   :  { %2317 = vmatprep.subr.bf16.mxu0 %v2606_v41 }
 0x1ec   :  { %2318 = vmatpush3.bf16.msra.mxu0 %v2477_v58 }
 0x1ed   :  { %2319 = vmatprep.subr.bf16.mxu0 %v2606_v41 }
 0x1f0   :  { %2320 = vmatpush3.bf16.msra.mxu0 %v2478_v59 }
 0x1f1   :  { %2321 = vmatprep.subr.bf16.mxu0 %v2606_v41 }
 0x1f4   :  { %2322 = vmatpush3.bf16.msra.mxu0 %v2479_v60  ;;  %v2501_v60 = vld [vmem:[%s3312_s15 + $0x190] ss:$28 sps:$4 sm:$0xff]  }
 0x1f5   :  { %2323 = vmatprep.subr.bf16.mxu0 %v2606_v41 }
 0x1f8   :  { %2324 = vmatpush3.bf16.msra.mxu0 %v2480_v61 }
 0x1f9   :  { %2325 = vmatprep.subr.bf16.mxu0 %v2606_v41 }
 0x1fc   :  { %2326 = vmatpush3.bf16.msra.mxu0 %v2481_v6  ;;  %v2525_v6 = vld [vmem:[%s3312_s15 + $0xb0] ss:$28 sps:$4 sm:$0xff]  }
 0x1fd   :  { %2351 = vmatprep.subr.bf16.mxu0 %v2606_v41 }
 0x29f   :  { %v870_v63 = vpop.f32.mrf.mxu0 }
 0x2a0   :  { %v871_v0 = vadd.f32 %v2006_v62, %v870_v63  ;;  %v2509_v62 = vld [vmem:[%s3312_s15 + $0x15c] ss:$28 sps:$4 sm:$0xff]  }
 0x2a1   :  { %v2289_v1 = vpop.f32.mrf.mxu0 }
 0x2a2   :  { %v876_v2 = vmax.f32 %v871_v0, 0.0  ;;  %v2507_v0 = vld [vmem:[%s3312_s15 + $0x158] ss:$28 sps:$4 sm:$0xff]   ;;  %v2515_v1 = vld [vmem:[%s3312_s15 + $0x124] ss:$28 sps:$4 sm:$0xff]  }
 0x2a3   :  { %v873_v3 = vpop.f32.mrf.mxu0 }
 0x2a4   :  { %v877_v4 = vpack.c.bf16 %v876_v2, %v876_v2  ;;  %v2513_v2 = vld [vmem:[%s3312_s15 + $0x120] ss:$28 sps:$4 sm:$0xff]   ;;  %v2521_v3 = vld [vmem:[%s3312_s15 + $0xec] ss:$28 sps:$4 sm:$0xff]  }
 0x2a5   :  { %v2290_v5 = vpop.f32.mrf.mxu0 }
 0x2a6   :  { %2308 = vmatmul.mubr.bf16.vlgmr.msra.gmra.mxu1 %v877_v4  ;;  %v2519_v4 = vld [vmem:[%s3312_s15 + $0xe8] ss:$28 sps:$4 sm:$0xff]   ;;  %v2527_v5 = vld [vmem:[%s3312_s15 + $0xb4] ss:$28 sps:$4 sm:$0xff]  }
 0x2a7   :  { %2347 = vmatprep.mubr.msk.bf16.mxu1 %vm2607_vm0, %v2606_v41  ;;  %2332 = vmatpush3.bf16.msra.mxu1 %v2482_v7  ;;  %v2533_v7 = vld [vmem:[%s3312_s15 + $0x7c] ss:$28 sps:$4 sm:$0xff]  }
 0x2a8   :  { %2333 = vmatprep.subr.bf16.mxu1 %v2606_v41 }
 0x2ab   :  { %2334 = vmatpush3.bf16.msra.mxu1 %v2483_v8  ;;  %v2531_v8 = vld [vmem:[%s3312_s15 + $0x78] ss:$28 sps:$4 sm:$0xff]  }
 0x2ac   :  { %2335 = vmatprep.subr.bf16.mxu1 %v2606_v41 }
 0x2af   :  { %2336 = vmatpush3.bf16.msra.mxu1 %v2484_v9  ;;  %v2539_v9 = vld [vmem:[%s3312_s15 + $0x44] ss:$28 sps:$4 sm:$0xff]  }
 0x2b0   :  { %2337 = vmatprep.subr.bf16.mxu1 %v2606_v41 }
 0x2b3   :  { %2338 = vmatpush3.bf16.msra.mxu1 %v2485_v10  ;;  %v2537_v10 = vld [vmem:[%s3312_s15 + $0x40] ss:$28 sps:$4 sm:$0xff]  }
 0x2b4   :  { %2339 = vmatprep.subr.bf16.mxu1 %v2606_v41 }
 0x2b7   :  { %2340 = vmatpush3.bf16.msra.mxu1 %v2486_v11  ;;  %v2542_v11 = vld [vmem:[%s3312_s15 + $0x4] ss:$28 sps:$4 sm:$0xff]  }
 0x2b8   :  { %2341 = vmatprep.subr.bf16.mxu1 %v2606_v41 }
 0x2bb   :  { %2342 = vmatpush3.bf16.msra.mxu1 %v2487_v12  ;;  %v2545_v12 = vld [vmem:[%s3312_s15 + $0xc] ss:$28 sps:$4 sm:$0xff]  }
 0x2bc   :  { %2343 = vmatprep.subr.bf16.mxu1 %v2606_v41 }
 0x2bf   :  { %2344 = vmatpush3.bf16.msra.mxu1 %v2488_v20 }
 0x2c0   :  { %2345 = vmatprep.subr.bf16.mxu1 %v2606_v41 }
 0x2c3   :  { %2346 = vmatpush3.bf16.msra.mxu1 %v2489_v21 }
 0x2c4   :  { %1719 = vmatprep.subr.bf16.mxu1 %v2500_v39  ;;  %v2568_v39 = vld [vmem:[%s3312_s15 + $0x84] ss:$28 sps:$4 sm:$0xff]  }
 0x366   :  { %v983_v14 = vpop.f32.mrf.mxu1 }
 0x367   :  { %v984_v15 = vadd.f32 %v2015_v13, %v983_v14  ;;  %v2540_v13 = vld [vmem:[%s3312_s15] ss:$28 sps:$4 sm:$0xff]   ;;  %v2543_v14 = vld [vmem:[%s3312_s15 + $0x8] ss:$28 sps:$4 sm:$0xff]  }
 0x368   :  { %v2309_v16 = vpop.f32.mrf.mxu1 }
 0x369   :  { %989 = vst [vmem:[%s3309_s17] sm:$0xff] %v984_v15  ;;  %v990_v17 = vpack.c.bf16 %v984_v15, %v984_v15  ;;  %v2548_v15 = vld [vmem:[%s3312_s15 + $0x19c] ss:$28 sps:$4 sm:$0xff]   ;;  %v2608_v16 = vmov 0  }
 0x36a   :  { %v986_v18 = vpop.f32.mrf.mxu1 }
 0x36b   :  { %2328 = vmatmul.mubr.bf16.vlgmr.msra.gmra.mxu0 %v990_v17  ;;  %v2042_v17 = vld [vmem:[%s3314_s14] ss:$0 sm:$0xff] }
 0x36c   :  { %v2310_v19 = vpop.f32.mrf.mxu1  ;;  %2367 = vmatprep.mubr.msk.bf16.mxu0 %vm2607_vm0, %v2606_v41  ;;  %2352 = vmatpush3.bf16.msra.mxu0 %v2490_v22 }
 0x36d   :  { %2353 = vmatprep.subr.bf16.mxu0 %v2606_v41 }
 0x370   :  { %2354 = vmatpush3.bf16.msra.mxu0 %v2491_v23  ;;  %v2546_v23 = vld [vmem:[%s3312_s15 + $0x198] ss:$28 sps:$4 sm:$0xff]  }
 0x371   :  { %2355 = vmatprep.subr.bf16.mxu0 %v2606_v41 }
 0x374   :  { %2356 = vmatpush3.bf16.msra.mxu0 %v2492_v24  ;;  %v2549_v24 = vld [vmem:[%s3312_s15 + $0x1a0] ss:$28 sps:$4 sm:$0xff]  }
 0x375   :  { %2357 = vmatprep.subr.bf16.mxu0 %v2606_v41 }
 0x378   :  { %2358 = vmatpush3.bf16.msra.mxu0 %v2493_v25 }
 0x379   :  { %2359 = vmatprep.subr.bf16.mxu0 %v2606_v41 }
 0x37c   :  { %2360 = vmatpush3.bf16.msra.mxu0 %v2494_v26  ;;  %v2552_v26 = vld [vmem:[%s3312_s15 + $0x164] ss:$28 sps:$4 sm:$0xff]  }
 0x37d   :  { %2361 = vmatprep.subr.bf16.mxu0 %v2606_v41 }
 0x380   :  { %2362 = vmatpush3.bf16.msra.mxu0 %v2495_v27 }
 0x381   :  { %2363 = vmatprep.subr.bf16.mxu0 %v2606_v41 }
 0x384   :  { %2364 = vmatpush3.bf16.msra.mxu0 %v2496_v36  ;;  %v2564_v36 = vld [vmem:[%s3312_s15 + $0xbc] ss:$28 sps:$4 sm:$0xff]  }
 0x385   :  { %2365 = vmatprep.subr.bf16.mxu0 %v2606_v41 }
 0x388   :  { %2366 = vmatpush3.bf16.msra.mxu0 %v2497_v37  ;;  %v2562_v37 = vld [vmem:[%s3312_s15 + $0xb8] ss:$28 sps:$4 sm:$0xff]  }
 0x389   :  { %1760 = vmatprep.subr.bf16.mxu0 %v2503_v40  ;;  %v2566_v40 = vld [vmem:[%s3312_s15 + $0x80] ss:$28 sps:$4 sm:$0xff]  }
 0x42b   :  { %v1096_v29 = vpop.f32.mrf.mxu0 }
 0x42c   :  { %v1097_v30 = vadd.f32 %v2024_v28, %v1096_v29  ;;  %v2550_v28 = vld [vmem:[%s3312_s15 + $0x160] ss:$28 sps:$4 sm:$0xff]   ;;  %v2553_v29 = vld [vmem:[%s3312_s15 + $0x168] ss:$28 sps:$4 sm:$0xff]  }
 0x42d   :  { %v2329_v31 = vpop.f32.mrf.mxu0 }
 0x42e   :  { %v1102_v32 = vmax.f32 %v1097_v30, 0.0  ;;  %v2556_v30 = vld [vmem:[%s3312_s15 + $0x12c] ss:$28 sps:$4 sm:$0xff]  }
 0x42f   :  { %v1099_v33 = vpop.f32.mrf.mxu0  ;;  %v2554_v31 = vld [vmem:[%s3312_s15 + $0x128] ss:$28 sps:$4 sm:$0xff]  }
 0x430   :  { %v1103_v34 = vpack.c.bf16 %v1102_v32, %v1102_v32  ;;  %v2557_v32 = vld [vmem:[%s3312_s15 + $0x130] ss:$28 sps:$4 sm:$0xff]  }
 0x431   :  { %v2330_v35 = vpop.f32.mrf.mxu0  ;;  %v2560_v33 = vld [vmem:[%s3312_s15 + $0xf4] ss:$28 sps:$4 sm:$0xff]  }
 0x432   :  { %2348 = vmatmul.mubr.bf16.vlgmr.msra.gmra.mxu1 %v1103_v34  ;;  %v2558_v34 = vld [vmem:[%s3312_s15 + $0xf0] ss:$28 sps:$4 sm:$0xff]   ;;  %v2561_v35 = vld [vmem:[%s3312_s15 + $0xf8] ss:$28 sps:$4 sm:$0xff]  }
 0x433   :  { %1720 = vmatpush1.bf16.msra.mxu1 %v2498_v38  ;;  %1751 = vmatprep.mubr.bf16.mxu1 %v2608_v16  ;;  %v2565_v38 = vld [vmem:[%s3312_s15 + $0xc0] ss:$28 sps:$4 sm:$0xff]  }
 0x434   :  { %1721 = vmatprep.subr.bf16.mxu1 %v2506_v42  ;;  %v2569_v42 = vld [vmem:[%s3312_s15 + $0x88] ss:$28 sps:$4 sm:$0xff]  }
 0x437   :  { %1722 = vmatpush1.bf16.msra.mxu1 %v2504_v43  ;;  %v2572_v43 = vld [vmem:[%s3312_s15 + $0x4c] ss:$28 sps:$4 sm:$0xff]  }
 0x438   :  { %1723 = vmatprep.subr.bf16.mxu1 %v2512_v44  ;;  %v2570_v44 = vld [vmem:[%s3312_s15 + $0x48] ss:$28 sps:$4 sm:$0xff]  }
 0x43b   :  { %1724 = vmatpush1.bf16.msra.mxu1 %v2510_v45  ;;  %v2573_v45 = vld [vmem:[%s3312_s15 + $0x50] ss:$28 sps:$4 sm:$0xff]  }
 0x43c   :  { %1725 = vmatprep.subr.bf16.mxu1 %v2518_v46  ;;  %v2576_v46 = vld [vmem:[%s3312_s15 + $0x14] ss:$28 sps:$4 sm:$0xff]  }
 0x43f   :  { %1726 = vmatpush1.bf16.msra.mxu1 %v2516_v47  ;;  %v2574_v47 = vld [vmem:[%s3312_s15 + $0x10] ss:$28 sps:$4 sm:$0xff]  }
 0x440   :  { %1727 = vmatprep.subr.bf16.mxu1 %v2524_v48  ;;  %v2577_v48 = vld [vmem:[%s3312_s15 + $0x18] ss:$28 sps:$4 sm:$0xff]  }
 0x443   :  { %1728 = vmatpush1.bf16.msra.mxu1 %v2522_v49  ;;  %v1396_v49 = vlaneseq }
 0x444   :  { %1729 = vmatprep.subr.bf16.mxu1 %v2530_v50 }
 0x445   :  { %v1397_v50 = vshrl.u32 %v1396_v49, 7 }
 0x447   :  { %1730 = vmatpush1.bf16.msra.mxu1 %v2528_v51  ;;  %v1398_v51 = vsub.s32 0, %v1397_v50 }
 0x448   :  { %1731 = vmatprep.subr.bf16.mxu1 %v2536_v52  ;;  %v1406_v52 = vsub.s32 2, %v1397_v50 }
 0x44b   :  { %1732 = vmatpush1.bf16.msra.mxu1 %v2534_v53  ;;  %v1394_v53 = vld [vmem:[%s3315_s16] sm:$0x7f] }
 0x44c   :  { %1733 = vmatprep.subr.bf16.mxu1 %v2542_v11 }
 0x44f   :  { %1734 = vmatpush1.bf16.msra.mxu1 %v2540_v13 }
 0x450   :  { %1801 = vmatprep.subr.bf16.mxu1 %v2548_v15 }
 0x4f2   :  { %v1209_v55 = vpop.f32.mrf.mxu1 }
 0x4f3   :  { %v1210_v56 = vadd.f32 %v2033_v54, %v1209_v55  ;;  %v1402_v54 = vsub.s32 1, %v1397_v50  ;;  %v1410_v55 = vsub.s32 3, %v1397_v50 }
 0x4f4   :  { %v2349_v57 = vpop.f32.mrf.mxu1 }
 0x4f5   :  { %v1215_v58 = vmax.f32 %v1210_v56, 0.0  ;;  %v1399_v56 = vrot.slane %v1394_v53, %v1398_v51  ;;  %v1407_v57 = vrot.slane %v1394_v53, %v1406_v52 }
 0x4f6   :  { %v1212_v59 = vpop.f32.mrf.mxu1 }
 0x4f7   :  { %v1216_v61 = vpack.c.bf16 %v1215_v58, %v1215_v58  ;;  %v1403_v58 = vrot.slane %v1394_v53, %v1402_v54  ;;  %v1411_v59 = vrot.slane %v1394_v53, %v1410_v55 }
 0x4f8   :  { %v2350_v63 = vpop.f32.mrf.mxu1 }
 0x4f9   :  { %2368 = vmatmul.mubr.bf16.vlgmr.msra.gmra.mxu0 %v1216_v61 }
 0x4fa   :  { %1761 = vmatpush1.bf16.msra.mxu0 %v2501_v60  ;;  %1792 = vmatprep.mubr.bf16.mxu0 %v2608_v16 }
 0x4fb   :  { %1762 = vmatprep.subr.bf16.mxu0 %v2509_v62 }
 0x4fe   :  { %1763 = vmatpush1.bf16.msra.mxu0 %v2507_v0 }
 0x4ff   :  { %1764 = vmatprep.subr.bf16.mxu0 %v2515_v1 }
 0x502   :  { %1765 = vmatpush1.bf16.msra.mxu0 %v2513_v2 }
 0x503   :  { %1766 = vmatprep.subr.bf16.mxu0 %v2521_v3 }
 0x506   :  { %1767 = vmatpush1.bf16.msra.mxu0 %v2519_v4 }
 0x507   :  { %1768 = vmatprep.subr.bf16.mxu0 %v2527_v5 }
 0x50a   :  { %1769 = vmatpush1.bf16.msra.mxu0 %v2525_v6 }
 0x50b   :  { %1770 = vmatprep.subr.bf16.mxu0 %v2533_v7 }
 0x50e   :  { %1771 = vmatpush1.bf16.msra.mxu0 %v2531_v8 }
 0x50f   :  { %1772 = vmatprep.subr.bf16.mxu0 %v2539_v9 }
 0x512   :  { %1773 = vmatpush1.bf16.msra.mxu0 %v2537_v10 }
 0x513   :  { %1774 = vmatprep.subr.bf16.mxu0 %v2545_v12 }
 0x516   :  { %1775 = vmatpush1.bf16.msra.mxu0 %v2543_v14 }
 0x517   :  { %2371 = vmatprep.subr.bf16.mxu0 %v2606_v41 }
 0x5b9   :  { %v1322_v18 = vpop.f32.mrf.mxu0 }
 0x5ba   :  { %v1323_v19 = vadd.f32 %v2042_v17, %v1322_v18 }
 0x5bb   :  { %v2369_v20 = vpop.f32.mrf.mxu0 }
 0x5bc   :  { %v1328_v21 = vmax.f32 %v1323_v19, 0.0  ;;  %v1414_v19 = vsub.s32 4, %v1397_v50  ;;  %v1422_v20 = vsub.s32 6, %v1397_v50 }
 0x5bd   :  { %v1325_v22 = vpop.f32.mrf.mxu0 }
 0x5be   :  { %v1329_v25 = vpack.c.bf16 %v1328_v21, %v1328_v21  ;;  %v1418_v21 = vsub.s32 5, %v1397_v50  ;;  %v1415_v22 = vrot.slane %v1394_v53, %v1414_v19 }
 0x5bf   :  { %v2370_v27 = vpop.f32.mrf.mxu0 }
 0x5c0   :  { %1752 = vmatmul.mubr.bf16.vlgmr.msra.gmra.mxu1 %v1329_v25  ;;  %1793 = vmatmul.mubr.bf16.vlgmr.msra.gmra.mxu0 %v1329_v25 }
 0x5c1   :  { %1802 = vmatpush1.bf16.msra.mxu1 %v2546_v23  ;;  %2372 = vmatpush3.bf16.msra.mxu0 %v2549_v24  ;;  %v1423_v23 = vrot.slane %v1394_v53, %v1422_v20  ;;  %v1419_v24 = vrot.slane %v1394_v53, %v1418_v21 }
 0x5c2   :  { %1803 = vmatprep.subr.bf16.mxu1 %v2552_v26  ;;  %2373 = vmatprep.subr.bf16.mxu0 %v2606_v41 }
 0x5c3   :  { %1833 = vmatprep.mubr.bf16.mxu1 %v2608_v16  ;;  %2387 = vmatprep.mubr.msk.bf16.mxu0 %vm2607_vm0, %v2606_v41 }
 0x5c5   :  { %1804 = vmatpush1.bf16.msra.mxu1 %v2550_v28  ;;  %2374 = vmatpush3.bf16.msra.mxu0 %v2553_v29 }
 0x5c6   :  { %1805 = vmatprep.subr.bf16.mxu1 %v2556_v30  ;;  %2375 = vmatprep.subr.bf16.mxu0 %v2606_v41 }
 0x5c9   :  { %1806 = vmatpush1.bf16.msra.mxu1 %v2554_v31  ;;  %2376 = vmatpush3.bf16.msra.mxu0 %v2557_v32 }
 0x5ca   :  { %1807 = vmatprep.subr.bf16.mxu1 %v2560_v33  ;;  %2377 = vmatprep.subr.bf16.mxu0 %v2606_v41 }
 0x5cd   :  { %1808 = vmatpush1.bf16.msra.mxu1 %v2558_v34  ;;  %2378 = vmatpush3.bf16.msra.mxu0 %v2561_v35 }
 0x5ce   :  { %1809 = vmatprep.subr.bf16.mxu1 %v2564_v36  ;;  %2379 = vmatprep.subr.bf16.mxu0 %v2606_v41 }
 0x5d1   :  { %1810 = vmatpush1.bf16.msra.mxu1 %v2562_v37  ;;  %2380 = vmatpush3.bf16.msra.mxu0 %v2565_v38 }
 0x5d2   :  { %1811 = vmatprep.subr.bf16.mxu1 %v2568_v39  ;;  %2381 = vmatprep.subr.bf16.mxu0 %v2606_v41 }
 0x5d5   :  { %1812 = vmatpush1.bf16.msra.mxu1 %v2566_v40  ;;  %2382 = vmatpush3.bf16.msra.mxu0 %v2569_v42 }
 0x5d6   :  { %1813 = vmatprep.subr.bf16.mxu1 %v2572_v43  ;;  %2383 = vmatprep.subr.bf16.mxu0 %v2606_v41 }
 0x5d9   :  { %1814 = vmatpush1.bf16.msra.mxu1 %v2570_v44  ;;  %2384 = vmatpush3.bf16.msra.mxu0 %v2573_v45 }
 0x5da   :  { %1815 = vmatprep.subr.bf16.mxu1 %v2576_v46  ;;  %2385 = vmatprep.subr.bf16.mxu0 %v2606_v41 }
 0x5dd   :  { %1816 = vmatpush1.bf16.msra.mxu1 %v2574_v47  ;;  %2386 = vmatpush3.bf16.msra.mxu0 %v2577_v48 }
 0x5e0   :  { %1834 = vmatmul.mubr.bf16.vlgmr.msra.gmra.mxu1 %v1329_v25  ;;  %2388 = vmatmul.mubr.bf16.vlgmr.msra.gmra.mxu0 %v1329_v25 }
 0x680   :  { %v1753_v60 = vpop.f32.mrf.mxu1  ;;  %v1794_v41 = vpop.f32.mrf.mxu0 }
 0x681   :  { %v1754_v61 = vadd.f32 %v1753_v60, %v1399_v56  ;;  %v1795_v62 = vadd.f32 %v1794_v41, %v1407_v57 }
 0x682   :  { %v1755_v63 = vpop.f32.mrf.mxu1  ;;  %v1796_v0 = vpop.f32.mrf.mxu0 }
 0x683   :  { %v2107_v1 = vmul.f32 -1.442695, %v1754_v61  ;;  %v2109_v2 = vmul.f32 -1.442695, %v1795_v62  ;;  %v1756_v3 = vadd.f32 %v1755_v63, %v1403_v58  ;;  %v1797_v4 = vadd.f32 %v1796_v0, %v1411_v59 }
 0x684   :  { %v1757_v5 = vpop.f32.mrf.mxu1  ;;  %v1798_v6 = vpop.f32.mrf.mxu0 }
 0x685   :  { %2578 = vpow2.f32 %v2107_v1  ;;  %v2108_v7 = vmul.f32 -1.442695, %v1756_v3  ;;  %v2110_v8 = vmul.f32 -1.442695, %v1797_v4 }
 0x686   :  { %2580 = vpow2.f32 %v2109_v2  ;;  %v1758_v9 = vpop.f32.mrf.mxu1  ;;  %v1799_v10 = vpop.f32.mrf.mxu0 }
 0x687   :  { %2582 = vpow2.f32 %v2108_v7 }
 0x688   :  { %2584 = vpow2.f32 %v2110_v8 }
 0x692   :  { %v2579_v11 = vpop.eup %2578 }
 0x693   :  { %v2581_v12 = vpop.eup %2580  ;;  %v1903_v13 = vadd.f32 1.0, %v2579_v11 }
 0x694   :  { %v2583_v14 = vpop.eup %2582  ;;  %v1905_v15 = vadd.f32 1.0, %v2581_v12 }
 0x695   :  { %v2585_v16 = vpop.eup %2584  ;;  %2586 = vrcp.f32 %v1903_v13  ;;  %v1904_v17 = vadd.f32 1.0, %v2583_v14 }
 0x696   :  { %2588 = vrcp.f32 %v1905_v15  ;;  %v1906_v18 = vadd.f32 1.0, %v2585_v16 }
 0x697   :  { %2590 = vrcp.f32 %v1904_v17 }
 0x698   :  { %2592 = vrcp.f32 %v1906_v18 }
 0x6a0   :  { %v1835_v25 = vpop.f32.mrf.mxu1  ;;  %v1876_v26 = vpop.f32.mrf.mxu0 }
 0x6a1   :  { %v1836_v27 = vadd.f32 %v1835_v25, %v1415_v22  ;;  %v1877_v28 = vadd.f32 %v1876_v26, %v1423_v23 }
 0x6a2   :  { %v2587_v29 = vpop.eup %2586  ;;  %v1837_v30 = vpop.f32.mrf.mxu1 }
 0x6a3   :  { %v2389_v31 = vpop.f32.mrf.mxu0  ;;  %v2589_v32 = vpop.eup %2588  ;;  %1924 = vst [vmem:[%s3316_s18] sm:$0xff] %v2587_v29  ;;  %v2111_v33 = vmul.f32 -1.442695, %v1836_v27  ;;  %v2113_v34 = vmul.f32 -1.442695, %v1877_v28  ;;  %v1838_v35 = vadd.f32 %v1837_v30, %v1419_v24 }
 0x6a4   :  { %v2591_v36 = vpop.eup %2590  ;;  %1926 = vst [vmem:[%s3316_s18 + $0x10] sm:$0xff] %v2589_v32  ;;  %v1839_v37 = vpop.f32.mrf.mxu1 }
 0x6a5   :  { %v1879_v38 = vpop.f32.mrf.mxu0  ;;  %v2593_v39 = vpop.eup %2592  ;;  %1925 = vst [vmem:[%s3316_s18 + $0x8] sm:$0xff] %v2591_v36  ;;  %2594 = vpow2.f32 %v2111_v33  ;;  %v2112_v40 = vmul.f32 -1.442695, %v1838_v35 }
 0x6a6   :  { %1927 = vst [vmem:[%s3316_s18 + $0x18] sm:$0xff] %v2593_v39  ;;  %2596 = vpow2.f32 %v2113_v34  ;;  %v1840_v42 = vpop.f32.mrf.mxu1 }
 0x6a7   :  { %v2390_v43 = vpop.f32.mrf.mxu0  ;;  %2598 = vpow2.f32 %v2112_v40 }
 0x6b2   :  { %v2595_v44 = vpop.eup %2594 }
 0x6b3   :  { %v2597_v45 = vpop.eup %2596  ;;  %v1907_v46 = vadd.f32 1.0, %v2595_v44 }
 0x6b4   :  { %v2599_v47 = vpop.eup %2598  ;;  %v1909_v48 = vadd.f32 1.0, %v2597_v45 }
 0x6b5   :  { %2600 = vrcp.f32 %v1907_v46  ;;  %v1908_v49 = vadd.f32 1.0, %v2599_v47 }
 0x6b6   :  { %2602 = vrcp.f32 %v1909_v48 }
 0x6b7   :  { %2604 = vrcp.f32 %v1908_v49 }
 0x6c2   :  { %v2601_v50 = vpop.eup %2600 }
 0x6c3   :  { %v2603_v51 = vpop.eup %2602  ;;  %1928 = vst [vmem:[%s3316_s18 + $0x20] sm:$0xff] %v2601_v50 }
 0x6c4   :  { %v2605_v52 = vpop.eup %2604  ;;  %1930 = vst.msk [vmem:[%s3316_s18 + $0x30] sm:$0xff] %vm486_vm1, %v2603_v51 }
 0x6c5   :  { %1929 = vst [vmem:[%s3316_s18 + $0x28] sm:$0xff] %v2605_v52 }

</bundles_post_ra>
